<compile_context>
chip_gen: v6e
topology: v6e:2x2x1
jax: 0.10.0
libtpu: 0.0.40
codegen_flags: <defaults>
</compile_context>

<pallas_src>
import jax
import jax.numpy as jnp
from jax.experimental import pallas as pl
from jax.experimental.pallas import tpu as pltpu


# ---------------------------------------------------------------------------
# Fused Pallas kernel: per-graph GCN x3 + mean-pool + FC
# ---------------------------------------------------------------------------
def _mpnn_fused_kernel(a_ref, x_ref, p_ref,
                       w1_ref, b1_ref, w2_ref, b2_ref, w3_ref, b3_ref,
                       fcw_ref, fcb_ref, o_ref):
    # a_ref: (1, n_pad, n_pad) bf16   per-graph normalized adjacency block
    # x_ref: (1, n_pad, F_pad) bf16   per-graph node features (zero padded)
    # p_ref: (1, 1, n_pad)    f32     mean-pool row vector (masks padded rows)
    a = a_ref[0]                       # (n_pad, n_pad) bf16
    h = x_ref[0]                       # (n_pad, F_pad) bf16

    def gcn(h_bf16, w_ref, b_ref):
        # feature transform on MXU (bf16 in, f32 accumulate)
        xw = jnp.dot(h_bf16, w_ref[...], preferred_element_type=jnp.float32)
        # neighborhood aggregation with the diagonal A_hat block
        ax = jnp.dot(a, xw.astype(jnp.bfloat16),
                     preferred_element_type=jnp.float32)
        # bias + ReLU in f32 on the VPU
        return jnp.maximum(ax + b_ref[...], 0.0)

    h = gcn(h, w1_ref, b1_ref)                          # (n_pad, H_pad) f32
    h = gcn(h.astype(jnp.bfloat16), w2_ref, b2_ref)
    h = gcn(h.astype(jnp.bfloat16), w3_ref, b3_ref)

    # global_mean_pool for this graph: (1, n_pad) @ (n_pad, H_pad)
    pooled = jnp.dot(p_ref[0], h, preferred_element_type=jnp.float32)
    out = jnp.dot(pooled.astype(jnp.bfloat16), fcw_ref[...],
                  preferred_element_type=jnp.float32) + fcb_ref[...]
    o_ref[0] = out                                      # (1, O_pad) f32


def mpnn_forward(params, a_blk, x_blk, p_vec):
    """Fused forward. Returns padded logits of shape (G, 1, O_pad)."""
    g, n_pad, _ = a_blk.shape
    fin_pad = x_blk.shape[2]
    (w1, b1), (w2, b2), (w3, b3) = params["convs"]
    fcw, fcb = params["fc_w"], params["fc_b"]
    h_pad = w1.shape[1]
    o_pad = fcw.shape[1]

    # Advisory cost estimate (per-graph matmuls x G graphs).
    flops_l1 = 2 * n_pad * fin_pad * h_pad + 2 * n_pad * n_pad * h_pad
    flops_lk = 2 * n_pad * h_pad * h_pad + 2 * n_pad * n_pad * h_pad
    flops = g * (flops_l1 + 2 * flops_lk + 2 * n_pad * h_pad + 2 * h_pad * o_pad)
    bytes_accessed = (
        a_blk.size * a_blk.dtype.itemsize
        + x_blk.size * x_blk.dtype.itemsize
        + p_vec.size * p_vec.dtype.itemsize
        + sum(w.size * w.dtype.itemsize + b.size * b.dtype.itemsize
              for w, b in params["convs"])
        + fcw.size * fcw.dtype.itemsize + fcb.size * fcb.dtype.itemsize
        + g * o_pad * 4
    )

    wspec = lambda shape: pl.BlockSpec(shape, lambda i: (0, 0))

    return pl.pallas_call(
        _mpnn_fused_kernel,
        out_shape=jax.ShapeDtypeStruct((g, 1, o_pad), jnp.float32),
        grid=(g,),
        in_specs=[
            pl.BlockSpec((1, n_pad, n_pad), lambda i: (i, 0, 0)),   # A_hat block
            pl.BlockSpec((1, n_pad, fin_pad), lambda i: (i, 0, 0)),  # X block
            pl.BlockSpec((1, 1, n_pad), lambda i: (i, 0, 0)),        # pool vector
            wspec((fin_pad, h_pad)), wspec((1, h_pad)),              # layer 1
            wspec((h_pad, h_pad)), wspec((1, h_pad)),                # layer 2
            wspec((h_pad, h_pad)), wspec((1, h_pad)),                # layer 3
            wspec((h_pad, o_pad)), wspec((1, o_pad)),                # fc
        ],
        out_specs=pl.BlockSpec((1, 1, o_pad), lambda i: (i, 0, 0)),
        compiler_params=pltpu.CompilerParams(
            dimension_semantics=("parallel",),          # graphs are independent
            vmem_limit_bytes=32 * 1024 * 1024,
        ),
        cost_estimate=pl.CostEstimate(
            flops=flops, transcendentals=0, bytes_accessed=bytes_accessed),
    )(a_blk, x_blk, p_vec, w1, b1, w2, b2, w3, b3, fcw, fcb)


# ---------------------------------------------------------------------------
# Plain-JAX glue: graph-structure preprocessing (not kernel work)
# ---------------------------------------------------------------------------
def _round_up(v, m):
    return ((v + m - 1) // m) * m


def _pad2(x, rows, cols):
    return jnp.pad(x, ((0, rows - x.shape[0]), (0, cols - x.shape[1])))


def gcn_norm_adj(edge_index, num_nodes):
    """A_hat = D^{-1/2} (A + I) D^{-1/2}; A[dst, src] = 1 (messages src->dst).
    Note: duplicate edges collapse to weight 1 (simple-graph assumption)."""
    src, dst = edge_index[0], edge_index[1]
    a = jnp.zeros((num_nodes, num_nodes), jnp.float32)
    a = a.at[dst, src].set(1.0)
    a = a.at[jnp.arange(num_nodes), jnp.arange(num_nodes)].set(1.0)
    deg = a.sum(axis=1)
    d_inv_sqrt = jnp.where(deg > 0, jax.lax.rsqrt(deg), 0.0)
    return a * d_inv_sqrt[:, None] * d_inv_sqrt[None, :]


def block_diag_adj(a_hat, num_graphs, nodes_per_graph, n_pad):
    """Extract per-graph diagonal blocks of A_hat (no cross-graph edges)."""
    blocks = a_hat.reshape(num_graphs, nodes_per_graph,
                           num_graphs, nodes_per_graph)
    idx = jnp.arange(num_graphs)
    blocks = blocks[idx, :, idx, :]                     # (G, n_g, n_g)
    pad = n_pad - nodes_per_graph
    return jnp.pad(blocks, ((0, 0), (0, pad), (0, pad)))


def mean_pool_vectors(num_graphs, nodes_per_graph, n_pad):
    """p[g, 0, i] = 1/n_g for valid node rows, 0 for padded rows."""
    valid = (jnp.arange(n_pad) < nodes_per_graph).astype(jnp.float32)
    p = valid / float(nodes_per_graph)
    return jnp.broadcast_to(p[None, None, :], (num_graphs, 1, n_pad)).copy()


def init_params(key, input_dim, hidden_dim, output_dim, num_layers,
                fin_pad, h_pad, o_pad):
    """Deterministic init; weights zero-padded to lane-dense shapes (bf16)."""
    params = {"convs": []}
    dims = [input_dim] + [hidden_dim] * num_layers
    pdims = [fin_pad] + [h_pad] * num_layers
    for li in range(num_layers):
        key, kw = jax.random.split(key)
        w = (jax.random.normal(kw, (dims[li], dims[li + 1]), jnp.float32)
             / jnp.sqrt(dims[li]))
        w = _pad2(w, pdims[li], pdims[li + 1]).astype(jnp.bfloat16)
        b = jnp.zeros((1, pdims[li + 1]), jnp.float32)
        params["convs"].append((w, b))
    key, kw = jax.random.split(key)
    fcw = (jax.random.normal(kw, (hidden_dim, output_dim), jnp.float32)
           / jnp.sqrt(hidden_dim))
    params["fc_w"] = _pad2(fcw, h_pad, o_pad).astype(jnp.bfloat16)
    params["fc_b"] = jnp.zeros((1, o_pad), jnp.float32)
    return params


# ---------------------------------------------------------------------------
if __name__ == "__main__":
    # Small synthetic batch: 2 graphs x 8 nodes, input_dim=8,
    # hidden_dim=64, output_dim=2 (matching the module spec), 3 GCN layers.
    num_graphs = 2
    nodes_per_graph = 8
    num_nodes = num_graphs * nodes_per_graph
    input_dim, hidden_dim, output_dim = 8, 64, 2
    num_layers = 3

    # Lane-dense / sublane-aligned padded sizes.
    n_pad = max(8, _round_up(nodes_per_graph, 8))
    fin_pad = _round_up(input_dim, 128)
    h_pad = _round_up(hidden_dim, 128)
    o_pad = _round_up(output_dim, 128)

    key = jax.random.PRNGKey(0)
    key, kx = jax.random.split(key)
    x = jax.random.normal(kx, (num_nodes, input_dim), jnp.float32)

    # Bidirectional ring edges within each graph (no cross-graph edges).
    src_list, dst_list = [], []
    for g in range(num_graphs):
        base = g * nodes_per_graph
        for i in range(nodes_per_graph):
            u, v = base + i, base + (i + 1) % nodes_per_graph
            src_list += [u, v]
            dst_list += [v, u]
    edge_index = jnp.array([src_list, dst_list], dtype=jnp.int32)

    # Preprocess graph structure into dense, kernel-friendly operands.
    a_hat = gcn_norm_adj(edge_index, num_nodes)
    a_blk = block_diag_adj(a_hat, num_graphs, nodes_per_graph,
                           n_pad).astype(jnp.bfloat16)        # (G, n_pad, n_pad)
    x_blk = x.reshape(num_graphs, nodes_per_graph, input_dim)
    x_blk = jnp.pad(x_blk, ((0, 0),
                            (0, n_pad - nodes_per_graph),
                            (0, fin_pad - input_dim))).astype(jnp.bfloat16)
    p_vec = mean_pool_vectors(num_graphs, nodes_per_graph, n_pad)  # (G, 1, n_pad)

    params = init_params(key, input_dim, hidden_dim, output_dim, num_layers,
                         fin_pad, h_pad, o_pad)

    out_padded = jax.jit(mpnn_forward)(params, a_blk, x_blk, p_vec)
    out_padded = jax.block_until_ready(out_padded)
    out = out_padded[:, 0, :output_dim]                   # (G, output_dim)
    assert out.shape == (num_graphs, output_dim)
    assert bool(jnp.all(jnp.isfinite(out)))
    print("KERNEL_OK")
</pallas_src>

<mosaic_0001>
module attributes {stable_mosaic.version = 11 : i64} {
  func.func @_mpnn_fused_kernel(%arg0: i32, %arg1: memref<1x8x8xbf16, #tpu.memory_space<vmem>>, %arg2: memref<1x8x128xbf16, #tpu.memory_space<vmem>>, %arg3: memref<1x1x8xf32, #tpu.memory_space<vmem>>, %arg4: memref<128x128xbf16, #tpu.memory_space<vmem>>, %arg5: memref<1x128xf32, #tpu.memory_space<vmem>>, %arg6: memref<128x128xbf16, #tpu.memory_space<vmem>>, %arg7: memref<1x128xf32, #tpu.memory_space<vmem>>, %arg8: memref<128x128xbf16, #tpu.memory_space<vmem>>, %arg9: memref<1x128xf32, #tpu.memory_space<vmem>>, %arg10: memref<128x128xbf16, #tpu.memory_space<vmem>>, %arg11: memref<1x128xf32, #tpu.memory_space<vmem>>, %arg12: memref<1x1x128xf32, #tpu.memory_space<vmem>>) attributes {dimension_semantics = [#tpu.dimension_semantics<parallel>], iteration_bounds = array<i64: 2>, scalar_prefetch = 0 : i64, scratch_operands = 0 : i64, tpu.core_type = #tpu.core_type<tc>, window_params = [{transform_indices = @transform_0, window_bounds = array<i64: 1, 8, 8>}, {transform_indices = @transform_1, window_bounds = array<i64: 1, 8, 128>}, {transform_indices = @transform_2, window_bounds = array<i64: 1, 1, 8>}, {pipeline_mode = #tpu.pipeline_mode<synchronous>, transform_indices = @transform_3, window_bounds = array<i64: 128, 128>}, {pipeline_mode = #tpu.pipeline_mode<synchronous>, transform_indices = @transform_4, window_bounds = array<i64: 1, 128>}, {pipeline_mode = #tpu.pipeline_mode<synchronous>, transform_indices = @transform_5, window_bounds = array<i64: 128, 128>}, {pipeline_mode = #tpu.pipeline_mode<synchronous>, transform_indices = @transform_6, window_bounds = array<i64: 1, 128>}, {pipeline_mode = #tpu.pipeline_mode<synchronous>, transform_indices = @transform_7, window_bounds = array<i64: 128, 128>}, {pipeline_mode = #tpu.pipeline_mode<synchronous>, transform_indices = @transform_8, window_bounds = array<i64: 1, 128>}, {pipeline_mode = #tpu.pipeline_mode<synchronous>, transform_indices = @transform_9, window_bounds = array<i64: 128, 128>}, {pipeline_mode = #tpu.pipeline_mode<synchronous>, transform_indices = @transform_10, window_bounds = array<i64: 1, 128>}, {transform_indices = @transform_11, window_bounds = array<i64: 1, 1, 128>}]} {
    %c0 = arith.constant 0 : index
    %c0_0 = arith.constant 0 : index
    %c0_1 = arith.constant 0 : index
    %0 = vector.load %arg1[%c0, %c0_0, %c0_1] : memref<1x8x8xbf16, #tpu.memory_space<vmem>>, vector<1x8x8xbf16>
    %1 = vector.shape_cast %0 : vector<1x8x8xbf16> to vector<8x8xbf16>
    %c0_2 = arith.constant 0 : index
    %c0_3 = arith.constant 0 : index
    %c0_4 = arith.constant 0 : index
    %2 = vector.load %arg2[%c0_2, %c0_3, %c0_4] : memref<1x8x128xbf16, #tpu.memory_space<vmem>>, vector<1x8x128xbf16>
    %3 = vector.shape_cast %2 : vector<1x8x128xbf16> to vector<8x128xbf16>
    %c0_5 = arith.constant 0 : index
    %c0_6 = arith.constant 0 : index
    %4 = vector.load %arg4[%c0_5, %c0_6] : memref<128x128xbf16, #tpu.memory_space<vmem>>, vector<128x128xbf16>
    %cst = arith.constant dense<0.000000e+00> : vector<8x128xf32>
    %5 = tpu.matmul %3, %4, %cst {dimension_numbers = #tpu.dot_dimension_numbers<[1], [0], [0], [1], [0, 0, 1, 1], [], []>} : vector<8x128xbf16>, vector<128x128xbf16>, vector<8x128xf32> -> vector<8x128xf32>
    %6 = arith.truncf %5 : vector<8x128xf32> to vector<8x128xbf16>
    %cst_7 = arith.constant dense<0.000000e+00> : vector<8x128xf32>
    %7 = tpu.matmul %1, %6, %cst_7 {dimension_numbers = #tpu.dot_dimension_numbers<[1], [0], [0], [1], [0, 0, 1, 1], [], []>} : vector<8x8xbf16>, vector<8x128xbf16>, vector<8x128xf32> -> vector<8x128xf32>
    %c0_8 = arith.constant 0 : index
    %c0_9 = arith.constant 0 : index
    %8 = vector.load %arg5[%c0_8, %c0_9] : memref<1x128xf32, #tpu.memory_space<vmem>>, vector<1x128xf32>
    %9 = vector.broadcast %8 : vector<1x128xf32> to vector<8x128xf32>
    %10 = arith.addf %7, %9 : vector<8x128xf32>
    %cst_10 = arith.constant 0.000000e+00 : f32
    %11 = vector.broadcast %cst_10 : f32 to vector<8x128xf32>
    %12 = arith.maximumf %10, %11 : vector<8x128xf32>
    %13 = arith.truncf %12 : vector<8x128xf32> to vector<8x128xbf16>
    %c0_11 = arith.constant 0 : index
    %c0_12 = arith.constant 0 : index
    %14 = vector.load %arg6[%c0_11, %c0_12] : memref<128x128xbf16, #tpu.memory_space<vmem>>, vector<128x128xbf16>
    %cst_13 = arith.constant dense<0.000000e+00> : vector<8x128xf32>
    %15 = tpu.matmul %13, %14, %cst_13 {dimension_numbers = #tpu.dot_dimension_numbers<[1], [0], [0], [1], [0, 0, 1, 1], [], []>} : vector<8x128xbf16>, vector<128x128xbf16>, vector<8x128xf32> -> vector<8x128xf32>
    %16 = arith.truncf %15 : vector<8x128xf32> to vector<8x128xbf16>
    %cst_14 = arith.constant dense<0.000000e+00> : vector<8x128xf32>
    %17 = tpu.matmul %1, %16, %cst_14 {dimension_numbers = #tpu.dot_dimension_numbers<[1], [0], [0], [1], [0, 0, 1, 1], [], []>} : vector<8x8xbf16>, vector<8x128xbf16>, vector<8x128xf32> -> vector<8x128xf32>
    %c0_15 = arith.constant 0 : index
    %c0_16 = arith.constant 0 : index
    %18 = vector.load %arg7[%c0_15, %c0_16] : memref<1x128xf32, #tpu.memory_space<vmem>>, vector<1x128xf32>
    %19 = vector.broadcast %18 : vector<1x128xf32> to vector<8x128xf32>
    %20 = arith.addf %17, %19 : vector<8x128xf32>
    %cst_17 = arith.constant 0.000000e+00 : f32
    %21 = vector.broadcast %cst_17 : f32 to vector<8x128xf32>
    %22 = arith.maximumf %20, %21 : vector<8x128xf32>
    %23 = arith.truncf %22 : vector<8x128xf32> to vector<8x128xbf16>
    %c0_18 = arith.constant 0 : index
    %c0_19 = arith.constant 0 : index
    %24 = vector.load %arg8[%c0_18, %c0_19] : memref<128x128xbf16, #tpu.memory_space<vmem>>, vector<128x128xbf16>
    %cst_20 = arith.constant dense<0.000000e+00> : vector<8x128xf32>
    %25 = tpu.matmul %23, %24, %cst_20 {dimension_numbers = #tpu.dot_dimension_numbers<[1], [0], [0], [1], [0, 0, 1, 1], [], []>} : vector<8x128xbf16>, vector<128x128xbf16>, vector<8x128xf32> -> vector<8x128xf32>
    %26 = arith.truncf %25 : vector<8x128xf32> to vector<8x128xbf16>
    %cst_21 = arith.constant dense<0.000000e+00> : vector<8x128xf32>
    %27 = tpu.matmul %1, %26, %cst_21 {dimension_numbers = #tpu.dot_dimension_numbers<[1], [0], [0], [1], [0, 0, 1, 1], [], []>} : vector<8x8xbf16>, vector<8x128xbf16>, vector<8x128xf32> -> vector<8x128xf32>
    %c0_22 = arith.constant 0 : index
    %c0_23 = arith.constant 0 : index
    %28 = vector.load %arg9[%c0_22, %c0_23] : memref<1x128xf32, #tpu.memory_space<vmem>>, vector<1x128xf32>
    %29 = vector.broadcast %28 : vector<1x128xf32> to vector<8x128xf32>
    %30 = arith.addf %27, %29 : vector<8x128xf32>
    %cst_24 = arith.constant 0.000000e+00 : f32
    %31 = vector.broadcast %cst_24 : f32 to vector<8x128xf32>
    %32 = arith.maximumf %30, %31 : vector<8x128xf32>
    %c0_25 = arith.constant 0 : index
    %c0_26 = arith.constant 0 : index
    %c0_27 = arith.constant 0 : index
    %33 = vector.load %arg3[%c0_25, %c0_26, %c0_27] : memref<1x1x8xf32, #tpu.memory_space<vmem>>, vector<1x1x8xf32>
    %34 = vector.shape_cast %33 : vector<1x1x8xf32> to vector<1x8xf32>
    %cst_28 = arith.constant dense<0.000000e+00> : vector<1x128xf32>
    %35 = tpu.matmul %34, %32, %cst_28 {dimension_numbers = #tpu.dot_dimension_numbers<[1], [0], [0], [1], [0, 0, 1, 1], [], []>} : vector<1x8xf32>, vector<8x128xf32>, vector<1x128xf32> -> vector<1x128xf32>
    %36 = arith.truncf %35 : vector<1x128xf32> to vector<1x128xbf16>
    %c0_29 = arith.constant 0 : index
    %c0_30 = arith.constant 0 : index
    %37 = vector.load %arg10[%c0_29, %c0_30] : memref<128x128xbf16, #tpu.memory_space<vmem>>, vector<128x128xbf16>
    %cst_31 = arith.constant dense<0.000000e+00> : vector<1x128xf32>
    %38 = tpu.matmul %36, %37, %cst_31 {dimension_numbers = #tpu.dot_dimension_numbers<[1], [0], [0], [1], [0, 0, 1, 1], [], []>} : vector<1x128xbf16>, vector<128x128xbf16>, vector<1x128xf32> -> vector<1x128xf32>
    %c0_32 = arith.constant 0 : index
    %c0_33 = arith.constant 0 : index
    %39 = vector.load %arg11[%c0_32, %c0_33] : memref<1x128xf32, #tpu.memory_space<vmem>>, vector<1x128xf32>
    %40 = arith.addf %38, %39 : vector<1x128xf32>
    %c0_34 = arith.constant 0 : index
    %c0_35 = arith.constant 0 : index
    %c0_36 = arith.constant 0 : index
    %41 = vector.load %arg12[%c0_34, %c0_35, %c0_36] : memref<1x1x128xf32, #tpu.memory_space<vmem>>, vector<1x1x128xf32>
    %42 = vector.shape_cast %41 : vector<1x1x128xf32> to vector<1x128xf32>
    %43 = vector.shape_cast %40 : vector<1x128xf32> to vector<1x1x128xf32>
    tpu.vector_store %arg12[%c0_34, %c0_35, %c0_36], %43 {strides = array<i32>} : memref<1x1x128xf32, #tpu.memory_space<vmem>>, vector<1x1x128xf32>,
    return
  }
  func.func @transform_0(%arg0: i32) -> (i32, i32, i32) {
    %c0_i32 = arith.constant 0 : i32
    %c0_i32_0 = arith.constant 0 : i32
    %c0_i32_1 = arith.constant 0 : i32
    return %arg0, %c0_i32, %c0_i32_0 : i32, i32, i32
  }
  func.func @transform_1(%arg0: i32) -> (i32, i32, i32) {
    %c0_i32 = arith.constant 0 : i32
    %c0_i32_0 = arith.constant 0 : i32
    %c0_i32_1 = arith.constant 0 : i32
    return %arg0, %c0_i32, %c0_i32_0 : i32, i32, i32
  }
  func.func @transform_2(%arg0: i32) -> (i32, i32, i32) {
    %c0_i32 = arith.constant 0 : i32
    %c0_i32_0 = arith.constant 0 : i32
    %c0_i32_1 = arith.constant 0 : i32
    return %arg0, %c0_i32, %c0_i32_0 : i32, i32, i32
  }
  func.func @transform_3(%arg0: i32) -> (i32, i32) {
    %c0_i32 = arith.constant 0 : i32
    %c0_i32_0 = arith.constant 0 : i32
    %c0_i32_1 = arith.constant 0 : i32
    return %c0_i32, %c0_i32_0 : i32, i32
  }
  func.func @transform_4(%arg0: i32) -> (i32, i32) {
    %c0_i32 = arith.constant 0 : i32
    %c0_i32_0 = arith.constant 0 : i32
    %c0_i32_1 = arith.constant 0 : i32
    return %c0_i32, %c0_i32_0 : i32, i32
  }
  func.func @transform_5(%arg0: i32) -> (i32, i32) {
    %c0_i32 = arith.constant 0 : i32
    %c0_i32_0 = arith.constant 0 : i32
    %c0_i32_1 = arith.constant 0 : i32
    return %c0_i32, %c0_i32_0 : i32, i32
  }
  func.func @transform_6(%arg0: i32) -> (i32, i32) {
    %c0_i32 = arith.constant 0 : i32
    %c0_i32_0 = arith.constant 0 : i32
    %c0_i32_1 = arith.constant 0 : i32
    return %c0_i32, %c0_i32_0 : i32, i32
  }
  func.func @transform_7(%arg0: i32) -> (i32, i32) {
    %c0_i32 = arith.constant 0 : i32
    %c0_i32_0 = arith.constant 0 : i32
    %c0_i32_1 = arith.constant 0 : i32
    return %c0_i32, %c0_i32_0 : i32, i32
  }
  func.func @transform_8(%arg0: i32) -> (i32, i32) {
    %c0_i32 = arith.constant 0 : i32
    %c0_i32_0 = arith.constant 0 : i32
    %c0_i32_1 = arith.constant 0 : i32
    return %c0_i32, %c0_i32_0 : i32, i32
  }
  func.func @transform_9(%arg0: i32) -> (i32, i32) {
    %c0_i32 = arith.constant 0 : i32
    %c0_i32_0 = arith.constant 0 : i32
    %c0_i32_1 = arith.constant 0 : i32
    return %c0_i32, %c0_i32_0 : i32, i32
  }
  func.func @transform_10(%arg0: i32) -> (i32, i32) {
    %c0_i32 = arith.constant 0 : i32
    %c0_i32_0 = arith.constant 0 : i32
    %c0_i32_1 = arith.constant 0 : i32
    return %c0_i32, %c0_i32_0 : i32, i32
  }
  func.func @transform_11(%arg0: i32) -> (i32, i32, i32) {
    %c0_i32 = arith.constant 0 : i32
    %c0_i32_0 = arith.constant 0 : i32
    %c0_i32_1 = arith.constant 0 : i32
    return %arg0, %c0_i32, %c0_i32_0 : i32, i32, i32
  }
}

</mosaic_0001>

<bundles_post_ra>
// kernel: mpnn_forward.1
= control target key start
LH: loop header
LB: loop body
LE: loop exit
PB: predicated region body
PF: predicated region fallthrough
CT: control target
= control target key end

     0   :  { %s2368_s0 = inlined_call_operand.vmem [shape: bf16[2,8,8], index: 0, kind: input, shape index: {}]   ;;  %s2369_s1 = inlined_call_operand.vmem [shape: bf16[2,8,128], index: 1, kind: input, shape index: {}]   ;;  %s2370_s2 = inlined_call_operand.vmem [shape: f32[2,1,8], index: 2, kind: input, shape index: {}]   ;;  %s2371_s3 = inlined_call_operand.hbm [shape: bf16[128,128], index: 3, kind: input, shape index: {}]   ;;  %s2372_s4 = inlined_call_operand.hbm [shape: f32[1,128], index: 4, kind: input, shape index: {}]   ;;  %s2373_s5 = inlined_call_operand.hbm [shape: bf16[128,128], index: 5, kind: input, shape index: {}]   ;;  %s2374_s6 = inlined_call_operand.hbm [shape: f32[1,128], index: 6, kind: input, shape index: {}]   ;;  %s2375_s7 = inlined_call_operand.hbm [shape: bf16[128,128], index: 7, kind: input, shape index: {}]   ;;  %s2376_s8 = inlined_call_operand.hbm [shape: f32[1,128], index: 8, kind: input, shape index: {}]   ;;  %s2377_s9 = inlined_call_operand.hbm [shape: bf16[128,128], index: 9, kind: input, shape index: {}]   ;;  %s2378_s10 = inlined_call_operand.hbm [shape: f32[1,128], index: 10, kind: input, shape index: {}]   ;;  %s2379_s11 = inlined_call_operand.hbm [shape: f32[2,1,128], index: 11, kind: output, shape index: {}]  }
   0x1   :  { %2384 = sst [smem:[#allocation25_spill]] %s2372_s4 }
   0x2   :  { %16 = vsyncpa [#allocation3], 0 }
   0x3   :  { %17 = vsyncpa [#allocation6], 0 }
   0x4   :  { %18 = vsyncpa [#allocation9], 0 }
   0x5   :  { %19 = vsyncpa [#allocation12], 0 }
   0x6   :  { %20 = vsyncpa [#allocation15], 0 }
   0x7   :  { %21 = vsyncpa [#allocation4], 0 }
   0x8   :  { %23 = vsyncpa [#allocation4 + $0x1], 0  ;;  %s2078_s17 = smov 0   ;;  %s2080_s18 = smov 0  }
   0x9   :  { %s2082_s19 = smov 0   ;;  %s2084_s20 = smov 0  }
   0xa LB: > { %2385 = sst [smem:[#allocation23_spill]] %s1999_s19  ;;  %s2099_s21 = sadd.s32 4294967295, %s2003_s20   ;;  %s2003_s20 = sphi %s2084_s20, %s2410_s20   ;;  %s1999_s19 = sphi %s2082_s19, %s2407_s19   ;;  %s1995_s18 = sphi %s2080_s18, %s2409_s18   ;;  %s1991_s17 = sphi %s2078_s17, %s2408_s17  }
   0xb   : > { %s1348_s22 = sadd.s32 4294967294, %s2003_s20   ;;  %s2103_s23 = sadd.s32 1, %s2003_s20  }
   0xc   : > { %s282_s24 = sadd.s32 1, %s1999_s19  ;;  %s279_s25 = ssub.s32 %s2003_s20, %s2103_s23 }
   0xd   : > { %p292_p0 = scmp.ne.s32.totalorder %s1999_s19, %s1995_s18  ;;  %p280_p1 = scmp.eq.s32.totalorder %s279_s25, 0 }
   0xe   : > { %p293_p2 = scmp.eq.s32.totalorder %s2099_s21, 1  ;;  %p298_p3 = scmp.ne.s32.totalorder %s1995_s18, %s1991_s17 }
   0xf   : > { %p299_p4 = scmp.eq.s32.totalorder %s1348_s22, 1  ;;  %p1349_p7 = scmp.ge.s32.totalorder %s2003_s20, 1 }
  0x10   : > { %s2114_s26 = scalar_select %p280_p1, %s1999_s19, %s282_s24  }
  0x11   : > { %p2116_p5 = por %p293_p2, %p292_p0  ;;  %p2120_p6 = por %p299_p4, %p298_p3 }
  0x12   : > { %2386 = sst [smem:[#allocation24_spill]] %s2114_s26  ;;  %p306_p8 = scmp.lt.s32.totalorder %s2003_s20, 3 }
  0x13   : > { %s2387_s27 = scalar_select %p2116_p5, 1, 0 }
  0x14   : > { %s2388_s28 = scalar_select %p2120_p6, 1, 0 }
  0x15   : > { %p2380_p9 = scmp.eq.s32.totalorder %s2099_s21, 0  ;;  %p2127_p10 = pnand %p1349_p7, %p306_p8 }
  0x16   : > { %s2005_s30 = smov [#allocation5]   ;;  %s2006_s13 = smov [#allocation8]  }
  0x17   : > { %s2389_s29 = scalar_select %p2127_p10, 1, 0 }
  0x18   : > { %s332_s12 = sshll.u32 %s2005_s30, 4  ;;  %p1593_p11 = pneg %p2127_p10  ;;  %s333_s12 = int_to_ptr.vmem [resolvable:$true] %s332_s12 }
  0x19   : > { %s356_s14 = sshll.u32 %s2006_s13, 4  ;;  %s2007_s16 = smov [#allocation11]   ;;  %s357_s14 = int_to_ptr.vmem [resolvable:$true] %s356_s14 }
  0x1a   : > { %p2135_p12 = pnand %p2380_p9, %p1593_p11  ;;  %s380_s22 = sshll.u32 %s2007_s16, 4  ;;  %s2139_s22 = int_to_ptr.vmem [resolvable:$true] %s380_s22 }
  0x1b   : > { %s1726_s25 = scalar_lea.vmem %s333_s12, 16  ;;  %s1733_s30 = scalar_lea.vmem %s333_s12, 32 }
  0x1c   : > { %p2143_p13 = pneg %p2135_p12  ;;  %p1727_p0 = scmp.ne.s32.totalorder %s333_s12, %s1726_s25 }
  0x1d   : > { %p1734_p3 = scmp.lt.s32.totalorder %s333_s12, %s333_s12  ;;  %p1735_p4 = scmp.lt.s32.totalorder %s1733_s30, %s1726_s25 }
  0x1e   : > { %p1729_p1 = pnand %p1727_p0, %p2143_p13 }
  0x1f   : > { %p1736_p7 = por %p1735_p4, %p1734_p3 }
  0x20   : > { %p1730_p2 = pneg %p1729_p1 }
  0x22   : > { %p1737_p8 = pnand %p1736_p7, %p1730_p2 }
  0x24   : > { %1740 = shalt.err (!%p1737_p8)
}
  0x25   : > { %s2392_s4 = sld [smem:[#allocation25_spill]]  ;;  %s1752_s26 = scalar_lea.vmem %s357_s14, 16 }
  0x26   : > { %p1753_p11 = scmp.ne.s32.totalorder %s357_s14, %s1752_s26  ;;  %s1759_s19 = scalar_lea.vmem %s357_s14, 32 }
  0x27   : > { %p1760_p0 = scmp.lt.s32.totalorder %s357_s14, %s357_s14  ;;  %p1761_p1 = scmp.lt.s32.totalorder %s1759_s19, %s1752_s26 }
  0x28   : > { %p1755_p9 = pnand %p1753_p11, %p2143_p13 }
  0x29   : > { %p1762_p5 = por %p1761_p1, %p1760_p0 }
  0x2a   : > { %p1756_p6 = pneg %p1755_p9 }
  0x2b   : > { %1599 = dma.hbm_to_vmem [thread:$0]  (!%p2135_p12), %s2392_s4, 16, %s333_s12, [#allocation6]  }
  0x2c   : > { %p1763_p10 = pnand %p1762_p5, %p1756_p6 }
  0x2e   : > { %1766 = shalt.err (!%p1763_p10)
}
  0x2f   : > { %1605 = dma.hbm_to_vmem [thread:$0]  (!%p2135_p12), %s2374_s6, 16, %s357_s14, [#allocation9]  }
  0x30   : > { %s1778_s12 = scalar_lea.vmem %s2139_s22, 16  ;;  %s1785_s19 = scalar_lea.vmem %s2139_s22, 32 }
  0x31   : > { %p1779_p2 = scmp.ne.s32.totalorder %s2139_s22, %s1778_s12  ;;  %p1786_p5 = scmp.lt.s32.totalorder %s2139_s22, %s2139_s22 }
  0x32   : > { %p1787_p6 = scmp.lt.s32.totalorder %s1785_s19, %s1778_s12 }
  0x33   : > { %p1781_p9 = pnand %p1779_p2, %p2143_p13 }
  0x34   : > { %p1788_p10 = por %p1787_p6, %p1786_p5 }
  0x35   : > { %p1782_p3 = pneg %p1781_p9 }
  0x37   : > { %p1789_p4 = pnand %p1788_p10, %p1782_p3 }
  0x39   : > { %1792 = shalt.err (!%p1789_p4)
}
  0x3a   : > { %1611 = dma.hbm_to_vmem [thread:$0]  (!%p2135_p12), %s2376_s8, 16, %s2139_s22, [#allocation12]  }
  0x3b   : > { %s2008_s14 = smov [#allocation2]  }
  0x3c   : > { %s318_s16 = sshll.u32 %s2008_s14, 4  ;;  %s319_s16 = int_to_ptr.vmem [resolvable:$true] %s318_s16 }
  0x3d   : > { %s1804_s25 = scalar_lea.vmem %s319_s16, 1024  ;;  %p1812_p0 = scmp.lt.s32.totalorder %s319_s16, %s319_s16 }
  0x3e   : > { %p1805_p7 = scmp.ne.s32.totalorder %s319_s16, %s1804_s25  ;;  %p1813_p1 = scmp.lt.s32.totalorder %s1804_s25, %s1804_s25 }
  0x40   : > { %p1807_p8 = pnand %p1805_p7, %p2143_p13  ;;  %p1814_p2 = por %p1813_p1, %p1812_p0 }
  0x42   : > { %p1808_p11 = pneg %p1807_p8 }
  0x44   : > { %p1815_p9 = pnand %p1814_p2, %p1808_p11 }
  0x46   : > { %1818 = shalt.err (!%p1815_p9)
}
  0x47   : > { %s2009_s30 = smov 64   ;;  %s2010_s12 = smov 4  }
  0x48   : > { %1596 = dma.hbm_to_vmem [thread:$0]  (!%p2135_p12), %s2371_s3, 1024, %s319_s16, [#allocation3], %s2009_s30, %s2009_s30, %s2010_s12  }
  0x49   : > { %s2011_s26 = smov [#allocation7]   ;;  %s2012_s14 = smov [#allocation10]  }
  0x4a   : > { %s342_s13 = sshll.u32 %s2011_s26, 4  ;;  %s366_s4 = sshll.u32 %s2012_s14, 4  ;;  %s343_s13 = int_to_ptr.vmem [resolvable:$true] %s342_s13  ;;  %s367_s4 = int_to_ptr.vmem [resolvable:$true] %s366_s4 }
  0x4b   : > { %s1830_s25 = scalar_lea.vmem %s343_s13, 1024  ;;  %p1838_p10 = scmp.lt.s32.totalorder %s343_s13, %s343_s13 }
  0x4c   : > { %p1831_p3 = scmp.ne.s32.totalorder %s343_s13, %s1830_s25  ;;  %p1839_p4 = scmp.lt.s32.totalorder %s1830_s25, %s1830_s25 }
  0x4e   : > { %p1833_p5 = pnand %p1831_p3, %p2143_p13  ;;  %p1840_p7 = por %p1839_p4, %p1838_p10 }
  0x50   : > { %p1834_p6 = pneg %p1833_p5 }
  0x52   : > { %p1841_p8 = pnand %p1840_p7, %p1834_p6 }
  0x54   : > { %1844 = shalt.err (!%p1841_p8)
}
  0x55   : > { %1602 = dma.hbm_to_vmem [thread:$0]  (!%p2135_p12), %s2373_s5, 1024, %s343_s13, [#allocation6], %s2009_s30, %s2009_s30, %s2010_s12  }
  0x56   : > { %s1856_s19 = scalar_lea.vmem %s367_s4, 1024  ;;  %p1864_p2 = scmp.lt.s32.totalorder %s367_s4, %s367_s4 }
  0x57   : > { %p1857_p11 = scmp.ne.s32.totalorder %s367_s4, %s1856_s19  ;;  %p1865_p9 = scmp.lt.s32.totalorder %s1856_s19, %s1856_s19 }
  0x59   : > { %p1859_p0 = pnand %p1857_p11, %p2143_p13  ;;  %p1866_p3 = por %p1865_p9, %p1864_p2 }
  0x5b   : > { %p1860_p1 = pneg %p1859_p0 }
  0x5d   : > { %p1867_p5 = pnand %p1866_p3, %p1860_p1 }
  0x5f   : > { %1870 = shalt.err (!%p1867_p5)
}
  0x60   : > { %1608 = dma.hbm_to_vmem [thread:$0]  (!%p2135_p12), %s2375_s7, 1024, %s367_s4, [#allocation9], %s2009_s30, %s2009_s30, %s2010_s12  }
  0x61   : > { %s2013_s13 = smov [#allocation13]   ;;  %s2014_s16 = smov [#allocation14]  }
  0x62   : > { %s390_s25 = sshll.u32 %s2013_s13, 4  ;;  %s404_s22 = sshll.u32 %s2014_s16, 4  ;;  %s391_s25 = int_to_ptr.vmem [resolvable:$true] %s390_s25  ;;  %s405_s22 = int_to_ptr.vmem [resolvable:$true] %s404_s22 }
  0x63   : > { %s1882_s19 = scalar_lea.vmem %s391_s25, 1024  ;;  %p1890_p7 = scmp.lt.s32.totalorder %s391_s25, %s391_s25 }
  0x64   : > { %p1883_p6 = scmp.ne.s32.totalorder %s391_s25, %s1882_s19  ;;  %p1891_p8 = scmp.lt.s32.totalorder %s1882_s19, %s1882_s19 }
  0x66   : > { %p1885_p10 = pnand %p1883_p6, %p2143_p13  ;;  %p1892_p11 = por %p1891_p8, %p1890_p7 }
  0x68   : > { %p1886_p4 = pneg %p1885_p10 }
  0x6a   : > { %p1893_p0 = pnand %p1892_p11, %p1886_p4 }
  0x6c   : > { %1896 = shalt.err (!%p1893_p0)
}
  0x6d   : > { %1614 = dma.hbm_to_vmem [thread:$0]  (!%p2135_p12), %s2377_s9, 1024, %s391_s25, [#allocation12], %s2009_s30, %s2009_s30, %s2010_s12  }
  0x6e   : > { %s1908_s14 = scalar_lea.vmem %s405_s22, 16  ;;  %s1915_s13 = scalar_lea.vmem %s405_s22, 32 }
  0x6f   : > { %p1909_p1 = scmp.ne.s32.totalorder %s405_s22, %s1908_s14  ;;  %p1916_p3 = scmp.lt.s32.totalorder %s405_s22, %s405_s22 }
  0x70   : > { %p1917_p5 = scmp.lt.s32.totalorder %s1915_s13, %s1908_s14 }
  0x71   : > { %p1911_p2 = pnand %p1909_p1, %p2143_p13 }
  0x72   : > { %p1918_p6 = por %p1917_p5, %p1916_p3 }
  0x73   : > { %p1912_p9 = pneg %p1911_p2 }
  0x75   : > { %p1919_p10 = pnand %p1918_p6, %p1912_p9 }
  0x77   : > { %1922 = shalt.err (!%p1919_p10)
}
  0x78   : > { %1617 = dma.hbm_to_vmem [thread:$0]  (!%p2135_p12), %s2378_s10, 16, %s405_s22, [#allocation15]  }
  0x79   : > { %p2393_p4 = scmp.ne.s32.totalorder %s2389_s29, 0 }
  0x7a   : > { %p2394_p7 = scmp.eq.s32.totalorder (!%p2393_p4), %s2099_s21, 0 }
  0x7b   : > { %437 = sbr.rel (%p2393_p4) target bundleno = 1772 (0x6ec), region = 64 }
  0x80   : > { %1966 = dma.done.wait (%p2394_p7), [#allocation3], 1024   ;;  %p2395_p13 = pmov %p2394_p7 }
  0x81   : > { %p2396_p8 = pmov %p2394_p7 }
  0x82   : > { %1968 = vsyncadd (%p2395_p13), [#allocation3], 4294966272 }
  0x83   : > { %1970 = dma.done.wait (%p2396_p8), [#allocation6], 1040   ;;  %p2397_p11 = pmov %p2394_p7 }
  0x84   : > { %p2398_p0 = pmov %p2394_p7 }
  0x85   : > { %1972 = vsyncadd (%p2397_p11), [#allocation6], 4294966256 }
  0x86   : > { %1974 = dma.done.wait (%p2398_p0), [#allocation9], 1040   ;;  %p2399_p12 = pmov %p2398_p0 }
  0x87   : > { %p2400_p1 = pmov %p2398_p0 }
  0x88   : > { %1976 = vsyncadd (%p2399_p12), [#allocation9], 4294966256 }
  0x89   : > { %1978 = dma.done.wait (%p2400_p1), [#allocation12], 1040   ;;  %p2401_p2 = pmov %p2398_p0 }
  0x8a   : > { %p2402_p9 = pmov %p2398_p0 }
  0x8b   : > { %1980 = vsyncadd (%p2401_p2), [#allocation12], 4294966256 }
  0x8c   : > { %1982 = dma.done.wait (%p2402_p9), [#allocation15], 16   ;;  %p2403_p3 = pmov %p2398_p0 }
  0x8d   : > { %v2015_v0 = vmov 0.0   ;;  %vm2016_vm0 = vmmov 0   ;;  %v1683_v1 = vld [vmem:[#allocation2 + $0x38] sm:$0xff]   ;;  %v1684_v2 = vld [vmem:[#allocation2 + $0x30] sm:$0xff]   ;;  %p510_p5 = scmp.lt.s32.totalorder %s2099_s21, 1  ;;  %v1685_v3 = vld [vmem:[#allocation2 + $0x28] sm:$0xff]  }
  0x8e   : > { %1984 = vsyncadd (%p2403_p3), [#allocation15], 4294967280  ;;  %1456 = vmatprep.subr.bf16.mxu0 %v2015_v0  ;;  %1472 = vmatprep.mubr.msk.bf16.mxu0 %vm2016_vm0, %v2015_v0  ;;  %v1686_v4 = vld [vmem:[#allocation2 + $0x20] sm:$0xff]   ;;  %v1687_v5 = vld [vmem:[#allocation2 + $0x18] sm:$0xff]   ;;  %vm640_vm1 = vcmask 1043456   ;;  %vm636_vm2 = vcmask 64512  }
  0x8f   : > { %1476 = vmatprep.subr.bf16.mxu1 %v2015_v0  ;;  %1478 = vmatprep.mubr.msk.bf16.mxu1 %vm2016_vm0, %v2015_v0  ;;  %s2253_s29 = scalar_select %p510_p5, %s2099_s21, 1  ;;  %v1688_v6 = vld [vmem:[#allocation2 + $0x10] sm:$0xff]   ;;  %v1689_v7 = vld [vmem:[#allocation2 + $0x8] sm:$0xff]   ;;  %v1690_v8 = vld [vmem:[#allocation2] sm:$0xff]  }
  0x90   : > { %1457 = vmatpush3.bf16.msra.mxu0 %v1683_v1  ;;  %v1691_v16 = vld [vmem:[#allocation7 + $0x38] sm:$0xff]   ;;  %v1692_v18 = vld [vmem:[#allocation7 + $0x30] sm:$0xff]   ;;  %v1693_v19 = vld [vmem:[#allocation7 + $0x28] sm:$0xff]   ;;  %s508_s16 = sand.u32 1, %s1995_s18   ;;  %s1409_s19 = sshll.u32 %s2099_s21, 4 }
  0x91   : > { %1458 = vmatprep.subr.bf16.mxu0 %v2015_v0  ;;  %s1368_s15 = sshll.u32 %s2253_s29, 2  ;;  %v1694_v20 = vld [vmem:[#allocation7 + $0x20] sm:$0xff]   ;;  %v1695_v21 = vld [vmem:[#allocation7 + $0x18] sm:$0xff]   ;;  %v1696_v22 = vld [vmem:[#allocation7 + $0x10] sm:$0xff]   ;;  %s520_s13 = scalar_lea.vmem %s2370_s2, %s2253_s29 }
  0x92   : > { %s517_s12 = scalar_lea.vmem %s2369_s1, %s1368_s15  ;;  %s513_s4 = scalar_lea.vmem %s2368_s0, %s1368_s15  ;;  %v1697_v23 = vld [vmem:[#allocation7 + $0x8] sm:$0xff]   ;;  %v1698_v24 = vld [vmem:[#allocation7] sm:$0xff]   ;;  %v1378_v25 = vld [vmem:[#allocation5] ss:$0 sm:$0xff] }
  0x93   : > { %v523_v9 = vld [vmem:[%s517_s12] sm:$0xf]  ;;  %v1700_v40 = vld [vmem:[#allocation10 + $0x30] sm:$0xff]   ;;  %v1701_v41 = vld [vmem:[#allocation10 + $0x28] sm:$0xff]   ;;  %s509_s29 = scalar_lea.vmem [#allocation16], %s508_s16  ;;  %s2327_s12 = scalar_lea.hbm %s2379_s11, %s1409_s19 }
  0x94   : > { %1459 = vmatpush3.bf16.msra.mxu0 %v1684_v2  ;;  %v2271_v15 = vld [vmem:[%s513_s4] sm:$0xf]  ;;  %v1702_v42 = vld [vmem:[#allocation10 + $0x20] sm:$0xff]   ;;  %v1704_v44 = vld [vmem:[#allocation10 + $0x10] sm:$0xff]   ;;  %s1193_s15 = sshll.u32 %s509_s29, 4  ;;  %s1181_s25 = scalar_lea.sflag [#allocation4], %s508_s16  ;;  %s2329_s15 = int_to_ptr.vmem [resolvable:$true] %s1193_s15 }
  0x95   : > { %1460 = vmatprep.subr.bf16.mxu0 %v2015_v0  ;;  %v1699_v38 = vld [vmem:[#allocation10 + $0x38] sm:$0xff]   ;;  %v1705_v45 = vld [vmem:[#allocation10 + $0x8] sm:$0xff]   ;;  %v1706_v46 = vld [vmem:[#allocation10] sm:$0xff]   ;;  %s1923_s22 = scalar_lea.vmem %s2329_s15, 16  ;;  %p2404_p10 = scmp.ne.s32.totalorder %s2387_s27, 0 }
  0x96   : > { %v1703_v43 = vld [vmem:[#allocation10 + $0x18] sm:$0xff]   ;;  %v1398_v61 = vld [vmem:[#allocation11] ss:$0 sm:$0xff]  ;;  %p1924_p6 = scmp.ne.s32.totalorder %s2329_s15, %s1923_s22  ;;  %s2017_s21 = smov [#allocation16]  }
  0x97   : > { %v1388_v47 = vld [vmem:[#allocation8] ss:$0 sm:$0xff]  ;;  %s1927_s4 = sshll.u32 %s2017_s21, 4  ;;  %s1928_s4 = int_to_ptr.vmem [resolvable:$false] %s1927_s4 }
  0x98   : > { %1461 = vmatpush3.bf16.msra.mxu0 %v1685_v3  ;;  %v999_v3 = vld [vmem:[%s520_s13] sm:$0x1]  ;;  %p1925_p4 = pnand %p1924_p6, %p2404_p10  ;;  %s1929_s26 = scalar_lea.vmem %s1928_s4, 32 }
  0x99   : > { %1462 = vmatprep.subr.bf16.mxu0 %v2015_v0  ;;  %p1930_p13 = scmp.lt.s32.totalorder %s2329_s15, %s1928_s4  ;;  %p1931_p8 = scmp.lt.s32.totalorder %s1929_s26, %s1923_s22 }
  0x9a   : > { %p1926_p7 = pneg %p1925_p4 }
  0x9b   : > { %p1932_p11 = por %p1931_p8, %p1930_p13 }
  0x9c   : > { %1463 = vmatpush3.bf16.msra.mxu0 %v1686_v4  ;;  %v1707_v4 = vld [vmem:[#allocation13 + $0x38] sm:$0xff]  }
  0x9d   : > { %1464 = vmatprep.subr.bf16.mxu0 %v2015_v0  ;;  %p1933_p0 = pnand %p1932_p11, %p1926_p7 }
  0xa0   : > { %1465 = vmatpush3.bf16.msra.mxu0 %v1687_v5 }
  0xa1   : > { %1466 = vmatprep.subr.bf16.mxu0 %v2015_v0 }
  0xa4   : > { %1467 = vmatpush3.bf16.msra.mxu0 %v1688_v6 }
  0xa5   : > { %1468 = vmatprep.subr.bf16.mxu0 %v2015_v0 }
  0xa8   : > { %1469 = vmatpush3.bf16.msra.mxu0 %v1689_v7  ;;  %v1708_v7 = vld [vmem:[#allocation13 + $0x30] sm:$0xff]  }
  0xa9   : > { %1470 = vmatprep.subr.bf16.mxu0 %v2015_v0 }
  0xac   : > { %1471 = vmatpush3.bf16.msra.mxu0 %v1690_v8  ;;  %v1709_v8 = vld [vmem:[#allocation13 + $0x28] sm:$0xff]  }
  0xad   : > { %1528 = vmatprep.subr.bf16.mxu0 %v2015_v0 }
  0xaf   : > { %1473 = vmatmul.mubr.bf16.vlgmr.msra.gmra.mxu0 %v523_v9  ;;  %v1710_v9 = vld [vmem:[#allocation13 + $0x20] sm:$0xff]  }
  0xb0   : > { %1530 = vmatprep.mubr.msk.bf16.mxu0 %vm2016_vm0, %v2015_v0 }
 0x16f   : > { %v622_v10 = vpop.f32.mrf.mxu0 }
 0x170   : > { %v628_v11 = vpack.c.bf16 %v622_v10, %v622_v10  ;;  %v1711_v10 = vld [vmem:[#allocation13 + $0x18] sm:$0xff]  }
 0x171   : > { %v1474_v12 = vpop.f32.mrf.mxu0 }
 0x172   : > { %v642_v13 = vsel %vm640_vm1, %v628_v11, 0  ;;  %v1712_v11 = vld [vmem:[#allocation13 + $0x10] sm:$0xff]   ;;  %v1713_v12 = vld [vmem:[#allocation13 + $0x8] sm:$0xff]  }
 0x173   : > { %v625_v14 = vpop.f32.mrf.mxu0  ;;  %1477 = vmatpush3.bf16.msra.mxu1 %v642_v13  ;;  %v1714_v13 = vld [vmem:[#allocation13] sm:$0xff]  }
 0x174   : > { %1482 = vmatprep.subr.bf16.mxu1 %v2015_v0 }
 0x175   : > { %v1475_v17 = vpop.f32.mrf.mxu0 }
 0x176   : > { %1479 = vmatmul.mubr.msk.bf16.vlgmr.msra.gmra.mxu1 %vm636_vm2, %v2271_v15  ;;  %v1090_v17 = vld [vmem:[#allocation14] sm:$0x1] }
 0x177   : > { %1483 = vmatpush3.bf16.msra.mxu1 %v1691_v16  ;;  %1498 = vmatprep.mubr.msk.bf16.mxu1 %vm2016_vm0, %v2015_v0 }
 0x178   : > { %1484 = vmatprep.subr.bf16.mxu1 %v2015_v0 }
 0x17b   : > { %1485 = vmatpush3.bf16.msra.mxu1 %v1692_v18 }
 0x17c   : > { %1486 = vmatprep.subr.bf16.mxu1 %v2015_v0 }
 0x17f   : > { %1487 = vmatpush3.bf16.msra.mxu1 %v1693_v19 }
 0x180   : > { %1488 = vmatprep.subr.bf16.mxu1 %v2015_v0 }
 0x183   : > { %1489 = vmatpush3.bf16.msra.mxu1 %v1694_v20 }
 0x184   : > { %1490 = vmatprep.subr.bf16.mxu1 %v2015_v0 }
 0x187   : > { %1491 = vmatpush3.bf16.msra.mxu1 %v1695_v21 }
 0x188   : > { %1492 = vmatprep.subr.bf16.mxu1 %v2015_v0 }
 0x18b   : > { %1493 = vmatpush3.bf16.msra.mxu1 %v1696_v22 }
 0x18c   : > { %1494 = vmatprep.subr.bf16.mxu1 %v2015_v0 }
 0x18f   : > { %1495 = vmatpush3.bf16.msra.mxu1 %v1697_v23 }
 0x190   : > { %1496 = vmatprep.subr.bf16.mxu1 %v2015_v0 }
 0x193   : > { %1497 = vmatpush3.bf16.msra.mxu1 %v1698_v24 }
 0x194   : > { %1502 = vmatprep.subr.bf16.mxu1 %v2015_v0 }
 0x236   : > { %v678_v26 = vpop.f32.mrf.mxu1 }
 0x237   : > { %v679_v27 = vadd.f32 %v1378_v25, %v678_v26 }
 0x238   : > { %v1480_v28 = vpop.f32.mrf.mxu1 }
 0x239   : > { %v684_v29 = vmax.f32 %v679_v27, 0.0 }
 0x23a   : > { %v681_v30 = vpop.f32.mrf.mxu1 }
 0x23b   : > { %v685_v31 = vpack.c.bf16 %v684_v29, %v684_v29 }
 0x23c   : > { %v1481_v32 = vpop.f32.mrf.mxu1 }
 0x23d   : > { %1499 = vmatmul.mubr.bf16.vlgmr.msra.gmra.mxu1 %v685_v31 }
 0x23e   : > { %1504 = vmatprep.mubr.msk.bf16.mxu1 %vm2016_vm0, %v2015_v0 }
 0x2fd   : > { %v784_v33 = vpop.f32.mrf.mxu1 }
 0x2fe   : > { %v790_v34 = vpack.c.bf16 %v784_v33, %v784_v33 }
 0x2ff   : > { %v1500_v35 = vpop.f32.mrf.mxu1 }
 0x300   : > { %v799_v36 = vsel %vm640_vm1, %v790_v34, 0 }
 0x301   : > { %v787_v37 = vpop.f32.mrf.mxu1  ;;  %1503 = vmatpush3.bf16.msra.mxu1 %v799_v36 }
 0x302   : > { %1508 = vmatprep.subr.bf16.mxu1 %v2015_v0 }
 0x303   : > { %v1501_v39 = vpop.f32.mrf.mxu1 }
 0x304   : > { %1505 = vmatmul.mubr.msk.bf16.vlgmr.msra.gmra.mxu1 %vm636_vm2, %v2271_v15 }
 0x305   : > { %1509 = vmatpush3.bf16.msra.mxu1 %v1699_v38  ;;  %1524 = vmatprep.mubr.msk.bf16.mxu1 %vm2016_vm0, %v2015_v0 }
 0x306   : > { %1510 = vmatprep.subr.bf16.mxu1 %v2015_v0 }
 0x309   : > { %1511 = vmatpush3.bf16.msra.mxu1 %v1700_v40 }
 0x30a   : > { %1512 = vmatprep.subr.bf16.mxu1 %v2015_v0 }
 0x30d   : > { %1513 = vmatpush3.bf16.msra.mxu1 %v1701_v41 }
 0x30e   : > { %1514 = vmatprep.subr.bf16.mxu1 %v2015_v0 }
 0x311   : > { %1515 = vmatpush3.bf16.msra.mxu1 %v1702_v42 }
 0x312   : > { %1516 = vmatprep.subr.bf16.mxu1 %v2015_v0 }
 0x315   : > { %1517 = vmatpush3.bf16.msra.mxu1 %v1703_v43 }
 0x316   : > { %1518 = vmatprep.subr.bf16.mxu1 %v2015_v0 }
 0x319   : > { %1519 = vmatpush3.bf16.msra.mxu1 %v1704_v44 }
 0x31a   : > { %1520 = vmatprep.subr.bf16.mxu1 %v2015_v0 }
 0x31d   : > { %1521 = vmatpush3.bf16.msra.mxu1 %v1705_v45 }
 0x31e   : > { %1522 = vmatprep.subr.bf16.mxu1 %v2015_v0 }
 0x321   : > { %1523 = vmatpush3.bf16.msra.mxu1 %v1706_v46 }
 0x3c4   : > { %v835_v48 = vpop.f32.mrf.mxu1 }
 0x3c5   : > { %v836_v49 = vadd.f32 %v1388_v47, %v835_v48 }
 0x3c6   : > { %v1506_v50 = vpop.f32.mrf.mxu1 }
 0x3c7   : > { %v841_v51 = vmax.f32 %v836_v49, 0.0 }
 0x3c8   : > { %v838_v52 = vpop.f32.mrf.mxu1 }
 0x3c9   : > { %v842_v53 = vpack.c.bf16 %v841_v51, %v841_v51 }
 0x3ca   : > { %v1507_v54 = vpop.f32.mrf.mxu1 }
 0x3cb   : > { %1525 = vmatmul.mubr.bf16.vlgmr.msra.gmra.mxu1 %v842_v53 }
 0x48b   : > { %v941_v55 = vpop.f32.mrf.mxu1 }
 0x48c   : > { %v947_v56 = vpack.c.bf16 %v941_v55, %v941_v55 }
 0x48d   : > { %v1526_v57 = vpop.f32.mrf.mxu1 }
 0x48e   : > { %v956_v58 = vsel %vm640_vm1, %v947_v56, 0 }
 0x48f   : > { %v944_v59 = vpop.f32.mrf.mxu1  ;;  %1529 = vmatpush3.bf16.msra.mxu0 %v956_v58 }
 0x490   : > { %1534 = vmatprep.subr.mxu0 %v2015_v0 }
 0x491   : > { %v1527_v60 = vpop.f32.mrf.mxu1 }
 0x492   : > { %1531 = vmatmul.mubr.msk.bf16.vlgmr.msra.gmra.mxu0 %vm636_vm2, %v2271_v15 }
 0x493   : > { %1536 = vmatprep.mubr.msk.f32.mxu0 %vm2016_vm0, %v2015_v0 }
 0x552   : > { %v992_v62 = vpop.f32.mrf.mxu0 }
 0x553   : > { %v993_v63 = vadd.f32 %v1398_v61, %v992_v62 }
 0x554   : > { %v1532_v1 = vpop.f32.mrf.mxu0 }
 0x555   : > { %v998_v2 = vmax.f32 %v993_v63, 0.0 }
 0x556   : > { %v995_v5 = vpop.f32.mrf.mxu0 }
 0x557   : > { %1535 = vmatpush3.msra.mxu0 %v998_v2 }
 0x558   : > { %v1533_v6 = vpop.f32.mrf.mxu0  ;;  %1537 = vmatmul.mubr.msk.f32.vlgmr.msra.gmra.mxu0 %vm636_vm2, %v999_v3  ;;  %1539 = vmatprep.subr.bf16.mxu0 %v2015_v0 }
 0x559   : > { %1540 = vmatpush3.bf16.msra.mxu0 %v1707_v4  ;;  %1555 = vmatprep.mubr.msk.bf16.mxu0 %vm2016_vm0, %v2015_v0 }
 0x55a   : > { %1541 = vmatprep.subr.bf16.mxu0 %v2015_v0 }
 0x55d   : > { %1542 = vmatpush3.bf16.msra.mxu0 %v1708_v7 }
 0x55e   : > { %1543 = vmatprep.subr.bf16.mxu0 %v2015_v0 }
 0x561   : > { %1544 = vmatpush3.bf16.msra.mxu0 %v1709_v8 }
 0x562   : > { %1545 = vmatprep.subr.bf16.mxu0 %v2015_v0 }
 0x565   : > { %1546 = vmatpush3.bf16.msra.mxu0 %v1710_v9 }
 0x566   : > { %1547 = vmatprep.subr.bf16.mxu0 %v2015_v0 }
 0x569   : > { %1548 = vmatpush3.bf16.msra.mxu0 %v1711_v10 }
 0x56a   : > { %1549 = vmatprep.subr.bf16.mxu0 %v2015_v0 }
 0x56d   : > { %1550 = vmatpush3.bf16.msra.mxu0 %v1712_v11 }
 0x56e   : > { %1551 = vmatprep.subr.bf16.mxu0 %v2015_v0 }
 0x571   : > { %1552 = vmatpush3.bf16.msra.mxu0 %v1713_v12 }
 0x572   : > { %1553 = vmatprep.subr.bf16.mxu0 %v2015_v0 }
 0x575   : > { %1554 = vmatpush3.bf16.msra.mxu0 %v1714_v13 }
 0x618   : > { %v1069_v14 = vpop.f32.mrf.mxu0 }
 0x619   : > { %v1073_v15 = vpack.c.bf16 %v1069_v14, %v1069_v14 }
 0x61a   : > { %v1538_v16 = vpop.f32.mrf.mxu0 }
 0x61b   : > { %1556 = vmatmul.mubr.bf16.vlgmr.msra.gmra.mxu0 %v1073_v15 }
 0x6db   : > { %v1173_v18 = vpop.f32.mrf.mxu0 }
 0x6dc   : > { %v1174_v19 = vadd.f32 %v1173_v18, %v1090_v17 }
 0x6dd   : > { %v1557_v0 = vpop.f32.mrf.mxu0 }
 0x6de   : > { %1179 = vst [vmem:[%s509_s29] sm:$0x1] %v1174_v19 }
 0x6df   : > { %v1176_v20 = vpop.f32.mrf.mxu0 }
 0x6e0   : > { %1936 = shalt.err (!%p1933_p0)
}
 0x6e1   : > { %s1937_s14 = scalar_lea.hbm %s2327_s12, 16  ;;  %s1941_s19 = scalar_lea.hbm %s2379_s11, 32 }
 0x6e2   : > { %p1938_p12 = scmp.ne.s32.totalorder %s2327_s12, %s1937_s14  ;;  %p1942_p9 = scmp.lt.s32.totalorder %s2327_s12, %s2379_s11 }
 0x6e3   : > { %p1943_p3 = scmp.lt.s32.totalorder %s1941_s19, %s1937_s14 }
 0x6e4   : > { %p1939_p1 = pnand %p1938_p12, %p2404_p10 }
 0x6e5   : > { %p1944_p5 = por %p1943_p3, %p1942_p9 }
 0x6e6   : > { %p1940_p2 = pneg %p1939_p1 }
 0x6e8   : > { %p1945_p6 = pnand %p1944_p5, %p1940_p2 }
 0x6ea   : > { %1948 = shalt.err (!%p1945_p6)
}
 0x6eb   : > { %1591 = dma.vmem_to_hbm [thread:$0]  (%p2404_p10), %s2329_s15, 16, %s2327_s12, %s1181_s25   ;;  %v1558_v21 = vpop.f32.mrf.mxu0 }
 0x6ec PF: > { %p1638_p4 = scmp.ge.s32.totalorder %s2003_s20, 2  ;;  %s1205_s30 = sand.u32 1, %s1991_s17  }
 0x6ed   : > { %p2405_p7 = scmp.ne.s32.totalorder %s2388_s28, 0  ;;  %s1206_s22 = scalar_lea.sflag [#allocation4], %s1205_s30 }
 0x6ef   : > { %p1619_p13 = pnand %p1638_p4, %p2405_p7 }
 0x6f1   : > { %p1620_p8 = pneg %p1619_p13 }
 0x6f3   : > { %1986 = dma.done.wait (%p1620_p8), %s1206_s22, 16  }
 0x6f4   : > { %1988 = vsyncadd (%p1620_p8), %s1206_s22, 4294967280  ;;  %s2406_s21 = sld [smem:[#allocation23_spill]]  ;;  %p26_p11 = scmp.ge.s32.totalorder %s2103_s23, 4  }
 0x6f5   : > { %s2407_s19 = sld [smem:[#allocation24_spill]]  ;;  %s2408_s17 = smov %s1995_s18 }
 0x6f6   : > { %s2410_s20 = smov %s2103_s23  ;;  %28 = sbr.rel (!%p26_p11) target bundleno = 10 (0xa), region = 138 }
 0x6fa   : > { %s2409_s18 = smov %s2406_s21 }
 0x6fb   :  { %1210 = vsyncpa [#allocation3], 1 }
 0x6fc   :  { %1212 = vsyncpa [#allocation3 + $0x1], 1 }
 0x6fd   :  { %1213 = vsyncpa [#allocation6], 1 }
 0x6fe   :  { %1214 = vsyncpa [#allocation9], 1 }
 0x6ff   :  { %1215 = vsyncpa [#allocation12], 1 }
 0x700   :  { %1216 = vsyncpa [#allocation15], 1 }
 0x701   :  { %1217 = vsyncpa [#allocation4], 1 }
 0x702   :  { %1219 = vsyncpa [#allocation4 + $0x1], 1 }

</bundles_post_ra>
